<compile_context>
chip_gen: v7x
topology: tpu7x:2x2x1
jax: 0.10.0
libtpu: 0.0.40
codegen_flags: <defaults>
</compile_context>

<pallas_src>
import functools

import jax
import jax.numpy as jnp
import numpy as np
from jax.experimental import pallas as pl
from jax.experimental.pallas import tpu as pltpu


# ------------------------------------------------------------------------------
# Pallas kernel: full CCVR dense forward for one batch tile.
# ------------------------------------------------------------------------------
def ccvr_kernel(nb, nt, H, *refs):
    """refs:
      idx_ref    (TB, F)   int32  offset-shifted embedding indices (batch-blocked)
      table_ref  (V, F*E)  bf16   per-field lane-placed embedding table (resident)
      bias_ref   (R, Wb)   f32    all biases, one per fused layer row (resident)
      w_refs...           bf16    fused weights (resident):
                                  nb bottoms, padded ctr, split cvr (2), nt towers
      out_ref    (TB, 3)   f32    lane-packed task probabilities
    """
    idx_ref, table_ref, bias_ref = refs[0], refs[1], refs[2]
    out_ref = refs[-1]
    w = refs[3:-1]
    assert len(w) == nb + 3 + nt

    TB, F = idx_ref.shape
    V = table_ref.shape[0]
    cdt = table_ref.dtype                           # compute dtype (bf16)

    biases = bias_ref[...]                          # (R, Wb) f32, tiny
    row = [0]

    def bias(n_out):
        b = biases[row[0]:row[0] + 1, :n_out]       # (1, n_out), static slice
        row[0] += 1
        return b

    def mm(x, w_ref):
        # bf16 x bf16 on the MXU, f32 accumulation.
        return jnp.dot(x, w_ref[...], preferred_element_type=jnp.float32)

    def lin_relu(x, w_ref):
        y = mm(x, w_ref) + bias(w_ref.shape[1])     # f32 epilogue
        return jnp.maximum(y, 0.0).astype(cdt)      # bf16 activations between layers

    # ---- in-kernel embedding gather: one-hot x lane-placed table ----
    idx = idx_ref[...]
    cols = jax.lax.broadcasted_iota(jnp.int32, (TB, V), 1)
    hit = cols == idx[:, 0:1]
    for f in range(1, F):
        hit = hit | (cols == idx[:, f:f + 1])
    emb = jnp.dot(hit.astype(cdt), table_ref[...],
                  preferred_element_type=jnp.float32).astype(cdt)   # (TB, F*E)

    # ---- fused bottoms: h1 = [fea0 | fea1 | fea2]  (TB, 3H) ----
    h = emb
    for l in range(nb):
        h = lin_relu(h, w[l])
    h1 = h

    # ---- ctr_info (padded weight: only the fea0 rows are nonzero) ----
    ctr = lin_relu(h1, w[nb])                                       # (TB, H)

    # ---- cvr_info: split-weight accumulation placed at lanes [H, 2H) ----
    f1 = jnp.maximum(mm(ctr, w[nb + 1]) + mm(h1, w[nb + 2]) + bias(3 * H),
                     0.0).astype(cdt)                               # (TB, 3H)
    cols3 = jax.lax.broadcasted_iota(jnp.int32, (TB, 3 * H), 1)
    mid = (cols3 >= H) & (cols3 < 2 * H)
    g = jnp.where(mid, f1, h1)      # [fea0 | new_fea1 | fea2] without cross-lane moves

    # ---- fused towers (block-diagonal); final layer -> lane-packed logits ----
    for l in range(nt - 1):
        g = lin_relu(g, w[nb + 3 + l])
    w_last = w[nb + 3 + nt - 1]
    logits = mm(g, w_last) + bias(w_last.shape[1])                  # (TB, 3)
    out_ref[...] = jax.nn.sigmoid(logits).astype(out_ref.dtype)


# ------------------------------------------------------------------------------
# Fused-parameter construction (done once, outside the hot path)
# ------------------------------------------------------------------------------
def _block_diag3(ws):
    din, dout = ws[0].shape
    out = jnp.zeros((3 * din, 3 * dout), ws[0].dtype)
    for i, wmat in enumerate(ws):
        out = out.at[i * din:(i + 1) * din, i * dout:(i + 1) * dout].set(wmat)
    return out


def place_table(table, field_dims, compute_dtype=jnp.bfloat16):
    """(V, E) shared table -> (V, F*E) with field f's rows placed in lane block f."""
    V, E = table.shape
    bounds = [0] + list(np.cumsum(np.asarray(field_dims, dtype=np.int64)))
    F = len(field_dims)
    out = jnp.zeros((V, F * E), table.dtype)
    for f in range(F):
        lo, hi = int(bounds[f]), int(bounds[f + 1])
        out = out.at[lo:hi, f * E:(f + 1) * E].set(table[lo:hi])
    return out.astype(compute_dtype)


def fuse_params(params, bottom_mlp_dims, tower_mlp_dims, compute_dtype=jnp.bfloat16):
    """Reference per-layer params -> (fused bf16 weights list, packed f32 bias matrix)."""
    H = bottom_mlp_dims[-1]
    it = iter(params)
    bottoms = [[next(it) for _ in bottom_mlp_dims] for _ in range(3)]
    w_ctr, b_ctr = next(it)
    _w_ctcvr, _b_ctcvr = next(it)      # dead ctcvr branch: never used in forward
    w_cv, b_cv = next(it)
    towers = [[next(it) for _ in range(len(tower_mlp_dims) + 1)] for _ in range(3)]

    weights, bias_rows = [], []

    # bottom layer 0: shared input -> concatenate along output lanes
    weights.append(jnp.concatenate([bottoms[t][0][0] for t in range(3)], axis=1)
                   .astype(compute_dtype))
    bias_rows.append(jnp.concatenate([bottoms[t][0][1] for t in range(3)], axis=1))
    # bottom layers 1..: block-diagonal
    for l in range(1, len(bottom_mlp_dims)):
        weights.append(_block_diag3([bottoms[t][l][0] for t in range(3)])
                       .astype(compute_dtype))
        bias_rows.append(jnp.concatenate([bottoms[t][l][1] for t in range(3)], axis=1))
    # ctr_info padded to consume the whole (3H) activation (only fea0 rows nonzero)
    w_ctr_p = jnp.zeros((3 * H, H), w_ctr.dtype).at[:H, :].set(w_ctr)
    weights.append(w_ctr_p.astype(compute_dtype))
    bias_rows.append(b_ctr)
    # cvr_info: split (2H, H) weight; outputs placed at lanes [H, 2H)
    w_cvt = jnp.zeros((H, 3 * H), w_cv.dtype).at[:, H:2 * H].set(w_cv[:H])
    w_cvb = jnp.zeros((3 * H, 3 * H), w_cv.dtype).at[H:2 * H, H:2 * H].set(w_cv[H:])
    b_cv_p = jnp.zeros((1, 3 * H), b_cv.dtype).at[:, H:2 * H].set(b_cv)
    weights += [w_cvt.astype(compute_dtype), w_cvb.astype(compute_dtype)]
    bias_rows.append(b_cv_p)
    # towers: block-diagonal (final layer -> (*, 3) lane-packed logits)
    for l in range(len(tower_mlp_dims) + 1):
        weights.append(_block_diag3([towers[t][l][0] for t in range(3)])
                       .astype(compute_dtype))
        bias_rows.append(jnp.concatenate([towers[t][l][1] for t in range(3)], axis=1))

    # pack all biases into one (rows, Wmax) f32 matrix, lane-/sublane-padded
    wmax = max(int(b.shape[1]) for b in bias_rows)
    wmax = ((wmax + 127) // 128) * 128
    nrows = ((len(bias_rows) + 7) // 8) * 8
    bias_mat = jnp.zeros((nrows, wmax), jnp.float32)
    for r, b in enumerate(bias_rows):
        bias_mat = bias_mat.at[r, :b.shape[1]].set(b[0].astype(jnp.float32))
    return weights, bias_mat


# ------------------------------------------------------------------------------
# Wrapper
# ------------------------------------------------------------------------------
def ccvr_forward(categorical_x, numerical_x, placed_table, offsets, weights, bias_mat, *,
                 bottom_mlp_dims, tower_mlp_dims, block_b=1024):
    """categorical_x: (B, F) int32; numerical_x unused (matches reference forward)."""
    del numerical_x
    B, F = categorical_x.shape
    V = placed_table.shape[0]
    nb = len(bottom_mlp_dims)
    nt = len(tower_mlp_dims) + 1
    H = bottom_mlp_dims[-1]

    # Only the offset-shifted indices travel per grid step (16 B/row).
    idx = (categorical_x + offsets[None, :]).astype(jnp.int32)

    # Batch tile: large (amortize ~0.35us/step fixed cost), multiple of 16 for bf16
    # sublane packing.  v7x: push to 2048-4096; v5e: cap ~1024 (single vst slot).
    TB = min(block_b, ((B + 15) // 16) * 16)
    TB = ((TB + 15) // 16) * 16
    Bp = ((B + TB - 1) // TB) * TB
    if Bp != B:
        idx = jnp.pad(idx, ((0, Bp - B), (0, 0)))   # padded rows gather row 0; sliced off

    const2 = lambda i: (0, 0)
    idx_spec = pl.BlockSpec((TB, F), lambda i: (i, 0))
    table_spec = pl.BlockSpec(placed_table.shape, const2)   # resident in VMEM
    bias_spec = pl.BlockSpec(bias_mat.shape, const2)        # resident in VMEM
    w_specs = [pl.BlockSpec(wmat.shape, const2) for wmat in weights]
    out_spec = pl.BlockSpec((TB, 3), lambda i: (i, 0))

    flops = 2 * Bp * (placed_table.shape[0] * placed_table.shape[1]
                      + sum(int(wmat.shape[0]) * int(wmat.shape[1]) for wmat in weights))
    bytes_accessed = (idx.size * 4 + Bp * 3 * 4 + placed_table.size * 2
                      + sum(int(wmat.size) * 2 for wmat in weights) + int(bias_mat.size) * 4)

    out = pl.pallas_call(
        functools.partial(ccvr_kernel, nb, nt, H),
        out_shape=jax.ShapeDtypeStruct((Bp, 3), jnp.float32),
        grid=(Bp // TB,),
        in_specs=[idx_spec, table_spec, bias_spec] + w_specs,
        out_specs=out_spec,
        compiler_params=pltpu.CompilerParams(
            dimension_semantics=("parallel",)),
        cost_estimate=pl.CostEstimate(flops=int(flops), transcendentals=int(3 * Bp),
                                      bytes_accessed=int(bytes_accessed)),
    )(idx, placed_table, bias_mat, *weights)

    out = out[:B]
    return [out[:, t] for t in range(3)]


# ------------------------------------------------------------------------------
# Deterministic parameter construction (reference layout)
# ------------------------------------------------------------------------------
def make_params(key, embed_output_dim, bottom_mlp_dims, tower_mlp_dims, task_num):
    H = bottom_mlp_dims[-1]

    def linear(key, d_in, d_out):
        kw, kb = jax.random.split(key)
        w = jax.random.normal(kw, (d_in, d_out), jnp.float32) * 0.1
        b = jax.random.normal(kb, (1, d_out), jnp.float32) * 0.01
        return w, b

    keys = iter(jax.random.split(key, 64))
    params = []
    for _ in range(task_num):                       # bottoms
        d_in = embed_output_dim
        for d_out in bottom_mlp_dims:
            params.append(linear(next(keys), d_in, d_out))
            d_in = d_out
    params.append(linear(next(keys), H, H))         # ctr_info
    params.append(linear(next(keys), H, H))         # ctcvr_info (unused in forward)
    params.append(linear(next(keys), 2 * H, H))     # cvr_info
    for _ in range(3):                              # towers
        d_in = H
        for d_out in tower_mlp_dims:
            params.append(linear(next(keys), d_in, d_out))
            d_in = d_out
        params.append(linear(next(keys), d_in, 1))
    return params


# ------------------------------------------------------------------------------
# Plain-JAX reference (mirrors the PyTorch forward exactly, f32)
# ------------------------------------------------------------------------------
def ccvr_reference(categorical_x, table, offsets, params, bottom_mlp_dims, tower_mlp_dims):
    B = categorical_x.shape[0]
    emb = jnp.take(table, categorical_x + offsets[None, :], axis=0).reshape(B, -1)
    idx = 0

    def lin(h, relu=True):
        nonlocal idx
        w, b = params[idx]; idx += 1
        y = h @ w + b
        return jnp.maximum(y, 0.0) if relu else y

    fea = []
    for _ in range(3):
        h = emb
        for _ in bottom_mlp_dims:
            h = lin(h)
        fea.append(h)
    ctr_info = lin(fea[0])
    _uncvr = lin(fea[2])
    new_cvr1 = jnp.concatenate([ctr_info, fea[1]], axis=1)
    fea1 = lin(new_cvr1)
    feas = [fea[0], fea1, fea[2]]
    results = []
    for t in range(3):
        h = feas[t]
        for _ in tower_mlp_dims:
            h = lin(h)
        h = lin(h, relu=False)
        results.append(jax.nn.sigmoid(h[:, 0]))
    return results


if __name__ == "__main__":
    # small, CCVR-consistent shapes
    categorical_field_dims = (10, 20, 30, 40)   # 4 fields
    numerical_num = 4
    embed_dim = 8
    bottom_mlp_dims = (64, 32)
    tower_mlp_dims = (32, 16)
    task_num = 3
    B = 64            # small batch; block_b=32 -> grid of 2 batch tiles

    embed_output_dim = len(categorical_field_dims) * embed_dim

    key = jax.random.PRNGKey(0)
    k_tab, k_par, k_cat, k_num = jax.random.split(key, 4)

    # embedding table + offsets
    total_vocab = int(np.sum(categorical_field_dims))
    table = jax.random.normal(k_tab, (total_vocab, embed_dim), jnp.float32) * 0.1
    offsets = jnp.asarray(
        np.array((0, *np.cumsum(categorical_field_dims)[:-1]), dtype=np.int32))

    params = make_params(k_par, embed_output_dim, bottom_mlp_dims, tower_mlp_dims, task_num)
    weights, bias_mat = fuse_params(params, bottom_mlp_dims, tower_mlp_dims,
                                    compute_dtype=jnp.bfloat16)
    placed_table = place_table(table, categorical_field_dims, compute_dtype=jnp.bfloat16)

    # inputs
    maxes = jnp.asarray(np.array(categorical_field_dims, dtype=np.int32))
    categorical_x = jax.random.randint(k_cat, (B, len(categorical_field_dims)), 0, 10000) % maxes
    categorical_x = categorical_x.astype(jnp.int32)
    numerical_x = jax.random.normal(k_num, (B, numerical_num), jnp.float32)  # unused by forward

    results = ccvr_forward(
        categorical_x, numerical_x, placed_table, offsets, weights, bias_mat,
        bottom_mlp_dims=bottom_mlp_dims, tower_mlp_dims=tower_mlp_dims,
        block_b=32)
    results = [jax.block_until_ready(r) for r in results]

    ref = ccvr_reference(categorical_x, table, offsets, params, bottom_mlp_dims, tower_mlp_dims)
    for r, rr in zip(results, ref):
        assert r.shape == (B,)
        # bf16 weights/table with f32 accumulation vs f32 reference -> looser tolerance
        np.testing.assert_allclose(np.asarray(r), np.asarray(rr), rtol=2e-2, atol=2e-2)

    print("KERNEL_OK")
</pallas_src>

<mosaic_0001>
module attributes {stable_mosaic.version = 11 : i64} {
  func.func @ccvr_kernel(%arg0: i32, %arg1: memref<32x4xi32, #tpu.memory_space<vmem>>, %arg2: memref<100x32xbf16, #tpu.memory_space<vmem>>, %arg3: memref<8x256xf32, #tpu.memory_space<vmem>>, %arg4: memref<32x192xbf16, #tpu.memory_space<vmem>>, %arg5: memref<192x96xbf16, #tpu.memory_space<vmem>>, %arg6: memref<96x32xbf16, #tpu.memory_space<vmem>>, %arg7: memref<32x96xbf16, #tpu.memory_space<vmem>>, %arg8: memref<96x96xbf16, #tpu.memory_space<vmem>>, %arg9: memref<96x96xbf16, #tpu.memory_space<vmem>>, %arg10: memref<96x48xbf16, #tpu.memory_space<vmem>>, %arg11: memref<48x3xbf16, #tpu.memory_space<vmem>>, %arg12: memref<32x3xf32, #tpu.memory_space<vmem>>) attributes {dimension_semantics = [#tpu.dimension_semantics<parallel>], iteration_bounds = array<i64: 2>, scalar_prefetch = 0 : i64, scratch_operands = 0 : i64, tpu.core_type = #tpu.core_type<tc>, window_params = [{transform_indices = @transform_0, window_bounds = array<i64: 32, 4>}, {pipeline_mode = #tpu.pipeline_mode<synchronous>, transform_indices = @transform_1, window_bounds = array<i64: 100, 32>}, {pipeline_mode = #tpu.pipeline_mode<synchronous>, transform_indices = @transform_2, window_bounds = array<i64: 8, 256>}, {pipeline_mode = #tpu.pipeline_mode<synchronous>, transform_indices = @transform_3, window_bounds = array<i64: 32, 192>}, {pipeline_mode = #tpu.pipeline_mode<synchronous>, transform_indices = @transform_4, window_bounds = array<i64: 192, 96>}, {pipeline_mode = #tpu.pipeline_mode<synchronous>, transform_indices = @transform_5, window_bounds = array<i64: 96, 32>}, {pipeline_mode = #tpu.pipeline_mode<synchronous>, transform_indices = @transform_6, window_bounds = array<i64: 32, 96>}, {pipeline_mode = #tpu.pipeline_mode<synchronous>, transform_indices = @transform_7, window_bounds = array<i64: 96, 96>}, {pipeline_mode = #tpu.pipeline_mode<synchronous>, transform_indices = @transform_8, window_bounds = array<i64: 96, 96>}, {pipeline_mode = #tpu.pipeline_mode<synchronous>, transform_indices = @transform_9, window_bounds = array<i64: 96, 48>}, {pipeline_mode = #tpu.pipeline_mode<synchronous>, transform_indices = @transform_10, window_bounds = array<i64: 48, 3>}, {transform_indices = @transform_11, window_bounds = array<i64: 32, 3>}]} {
    %c0 = arith.constant 0 : index
    %c0_0 = arith.constant 0 : index
    %0 = vector.load %arg3[%c0, %c0_0] : memref<8x256xf32, #tpu.memory_space<vmem>>, vector<8x256xf32>
    %c0_1 = arith.constant 0 : index
    %c0_2 = arith.constant 0 : index
    %1 = vector.load %arg1[%c0_1, %c0_2] : memref<32x4xi32, #tpu.memory_space<vmem>>, vector<32x4xi32>
    %2 = tpu.iota {dimensions = array<i32: 1>} : vector<32x100xi32>
    %3 = vector.extract_strided_slice %1 {offsets = [0, 0], sizes = [32, 1], strides = [1, 1]} : vector<32x4xi32> to vector<32x1xi32>
    %4 = vector.broadcast %3 : vector<32x1xi32> to vector<32x100xi32>
    %5 = arith.cmpi eq, %2, %4 : vector<32x100xi32>
    %6 = vector.extract_strided_slice %1 {offsets = [0, 1], sizes = [32, 1], strides = [1, 1]} : vector<32x4xi32> to vector<32x1xi32>
    %7 = vector.broadcast %6 : vector<32x1xi32> to vector<32x100xi32>
    %8 = arith.cmpi eq, %2, %7 : vector<32x100xi32>
    %9 = arith.ori %5, %8 : vector<32x100xi1>
    %10 = vector.extract_strided_slice %1 {offsets = [0, 2], sizes = [32, 1], strides = [1, 1]} : vector<32x4xi32> to vector<32x1xi32>
    %11 = vector.broadcast %10 : vector<32x1xi32> to vector<32x100xi32>
    %12 = arith.cmpi eq, %2, %11 : vector<32x100xi32>
    %13 = arith.ori %9, %12 : vector<32x100xi1>
    %14 = vector.extract_strided_slice %1 {offsets = [0, 3], sizes = [32, 1], strides = [1, 1]} : vector<32x4xi32> to vector<32x1xi32>
    %15 = vector.broadcast %14 : vector<32x1xi32> to vector<32x100xi32>
    %16 = arith.cmpi eq, %2, %15 : vector<32x100xi32>
    %17 = arith.ori %13, %16 : vector<32x100xi1>
    %18 = arith.extui %17 : vector<32x100xi1> to vector<32x100xi32>
    %19 = arith.sitofp %18 : vector<32x100xi32> to vector<32x100xf32>
    %20 = arith.truncf %19 : vector<32x100xf32> to vector<32x100xbf16>
    %c0_3 = arith.constant 0 : index
    %c0_4 = arith.constant 0 : index
    %21 = vector.load %arg2[%c0_3, %c0_4] : memref<100x32xbf16, #tpu.memory_space<vmem>>, vector<100x32xbf16>
    %cst = arith.constant dense<0.000000e+00> : vector<32x32xf32>
    %22 = tpu.matmul %20, %21, %cst {dimension_numbers = #tpu.dot_dimension_numbers<[1], [0], [0], [1], [0, 0, 1, 1], [], []>} : vector<32x100xbf16>, vector<100x32xbf16>, vector<32x32xf32> -> vector<32x32xf32>
    %23 = arith.truncf %22 : vector<32x32xf32> to vector<32x32xbf16>
    %c0_5 = arith.constant 0 : index
    %c0_6 = arith.constant 0 : index
    %24 = vector.load %arg4[%c0_5, %c0_6] : memref<32x192xbf16, #tpu.memory_space<vmem>>, vector<32x192xbf16>
    %cst_7 = arith.constant dense<0.000000e+00> : vector<32x192xf32>
    %25 = tpu.matmul %23, %24, %cst_7 {dimension_numbers = #tpu.dot_dimension_numbers<[1], [0], [0], [1], [0, 0, 1, 1], [], []>} : vector<32x32xbf16>, vector<32x192xbf16>, vector<32x192xf32> -> vector<32x192xf32>
    %26 = vector.extract_strided_slice %0 {offsets = [0, 0], sizes = [1, 192], strides = [1, 1]} : vector<8x256xf32> to vector<1x192xf32>
    %27 = vector.broadcast %26 : vector<1x192xf32> to vector<32x192xf32>
    %28 = arith.addf %25, %27 : vector<32x192xf32>
    %cst_8 = arith.constant 0.000000e+00 : f32
    %29 = vector.broadcast %cst_8 : f32 to vector<32x192xf32>
    %30 = arith.maximumf %28, %29 : vector<32x192xf32>
    %31 = arith.truncf %30 : vector<32x192xf32> to vector<32x192xbf16>
    %c0_9 = arith.constant 0 : index
    %c0_10 = arith.constant 0 : index
    %32 = vector.load %arg5[%c0_9, %c0_10] : memref<192x96xbf16, #tpu.memory_space<vmem>>, vector<192x96xbf16>
    %cst_11 = arith.constant dense<0.000000e+00> : vector<32x96xf32>
    %33 = tpu.matmul %31, %32, %cst_11 {dimension_numbers = #tpu.dot_dimension_numbers<[1], [0], [0], [1], [0, 0, 1, 1], [], []>} : vector<32x192xbf16>, vector<192x96xbf16>, vector<32x96xf32> -> vector<32x96xf32>
    %34 = vector.extract_strided_slice %0 {offsets = [1, 0], sizes = [1, 96], strides = [1, 1]} : vector<8x256xf32> to vector<1x96xf32>
    %35 = vector.broadcast %34 : vector<1x96xf32> to vector<32x96xf32>
    %36 = arith.addf %33, %35 : vector<32x96xf32>
    %cst_12 = arith.constant 0.000000e+00 : f32
    %37 = vector.broadcast %cst_12 : f32 to vector<32x96xf32>
    %38 = arith.maximumf %36, %37 : vector<32x96xf32>
    %39 = arith.truncf %38 : vector<32x96xf32> to vector<32x96xbf16>
    %c0_13 = arith.constant 0 : index
    %c0_14 = arith.constant 0 : index
    %40 = vector.load %arg6[%c0_13, %c0_14] : memref<96x32xbf16, #tpu.memory_space<vmem>>, vector<96x32xbf16>
    %cst_15 = arith.constant dense<0.000000e+00> : vector<32x32xf32>
    %41 = tpu.matmul %39, %40, %cst_15 {dimension_numbers = #tpu.dot_dimension_numbers<[1], [0], [0], [1], [0, 0, 1, 1], [], []>} : vector<32x96xbf16>, vector<96x32xbf16>, vector<32x32xf32> -> vector<32x32xf32>
    %42 = vector.extract_strided_slice %0 {offsets = [2, 0], sizes = [1, 32], strides = [1, 1]} : vector<8x256xf32> to vector<1x32xf32>
    %43 = vector.broadcast %42 : vector<1x32xf32> to vector<32x32xf32>
    %44 = arith.addf %41, %43 : vector<32x32xf32>
    %cst_16 = arith.constant 0.000000e+00 : f32
    %45 = vector.broadcast %cst_16 : f32 to vector<32x32xf32>
    %46 = arith.maximumf %44, %45 : vector<32x32xf32>
    %47 = arith.truncf %46 : vector<32x32xf32> to vector<32x32xbf16>
    %c0_17 = arith.constant 0 : index
    %c0_18 = arith.constant 0 : index
    %48 = vector.load %arg7[%c0_17, %c0_18] : memref<32x96xbf16, #tpu.memory_space<vmem>>, vector<32x96xbf16>
    %cst_19 = arith.constant dense<0.000000e+00> : vector<32x96xf32>
    %49 = tpu.matmul %47, %48, %cst_19 {dimension_numbers = #tpu.dot_dimension_numbers<[1], [0], [0], [1], [0, 0, 1, 1], [], []>} : vector<32x32xbf16>, vector<32x96xbf16>, vector<32x96xf32> -> vector<32x96xf32>
    %c0_20 = arith.constant 0 : index
    %c0_21 = arith.constant 0 : index
    %50 = vector.load %arg8[%c0_20, %c0_21] : memref<96x96xbf16, #tpu.memory_space<vmem>>, vector<96x96xbf16>
    %cst_22 = arith.constant dense<0.000000e+00> : vector<32x96xf32>
    %51 = tpu.matmul %39, %50, %cst_22 {dimension_numbers = #tpu.dot_dimension_numbers<[1], [0], [0], [1], [0, 0, 1, 1], [], []>} : vector<32x96xbf16>, vector<96x96xbf16>, vector<32x96xf32> -> vector<32x96xf32>
    %52 = arith.addf %49, %51 : vector<32x96xf32>
    %53 = vector.extract_strided_slice %0 {offsets = [3, 0], sizes = [1, 96], strides = [1, 1]} : vector<8x256xf32> to vector<1x96xf32>
    %54 = vector.broadcast %53 : vector<1x96xf32> to vector<32x96xf32>
    %55 = arith.addf %52, %54 : vector<32x96xf32>
    %cst_23 = arith.constant 0.000000e+00 : f32
    %56 = vector.broadcast %cst_23 : f32 to vector<32x96xf32>
    %57 = arith.maximumf %55, %56 : vector<32x96xf32>
    %58 = arith.truncf %57 : vector<32x96xf32> to vector<32x96xbf16>
    %59 = tpu.iota {dimensions = array<i32: 1>} : vector<32x96xi32>
    %c32_i32 = arith.constant 32 : i32
    %60 = vector.broadcast %c32_i32 : i32 to vector<32x96xi32>
    %61 = arith.cmpi sge, %59, %60 : vector<32x96xi32>
    %c64_i32 = arith.constant 64 : i32
    %62 = vector.broadcast %c64_i32 : i32 to vector<32x96xi32>
    %63 = arith.cmpi slt, %59, %62 : vector<32x96xi32>
    %64 = arith.andi %61, %63 : vector<32x96xi1>
    %65 = arith.select %64, %58, %39 : vector<32x96xi1>, vector<32x96xbf16>
    %c0_24 = arith.constant 0 : index
    %c0_25 = arith.constant 0 : index
    %66 = vector.load %arg9[%c0_24, %c0_25] : memref<96x96xbf16, #tpu.memory_space<vmem>>, vector<96x96xbf16>
    %cst_26 = arith.constant dense<0.000000e+00> : vector<32x96xf32>
    %67 = tpu.matmul %65, %66, %cst_26 {dimension_numbers = #tpu.dot_dimension_numbers<[1], [0], [0], [1], [0, 0, 1, 1], [], []>} : vector<32x96xbf16>, vector<96x96xbf16>, vector<32x96xf32> -> vector<32x96xf32>
    %68 = vector.extract_strided_slice %0 {offsets = [4, 0], sizes = [1, 96], strides = [1, 1]} : vector<8x256xf32> to vector<1x96xf32>
    %69 = vector.broadcast %68 : vector<1x96xf32> to vector<32x96xf32>
    %70 = arith.addf %67, %69 : vector<32x96xf32>
    %cst_27 = arith.constant 0.000000e+00 : f32
    %71 = vector.broadcast %cst_27 : f32 to vector<32x96xf32>
    %72 = arith.maximumf %70, %71 : vector<32x96xf32>
    %73 = arith.truncf %72 : vector<32x96xf32> to vector<32x96xbf16>
    %c0_28 = arith.constant 0 : index
    %c0_29 = arith.constant 0 : index
    %74 = vector.load %arg10[%c0_28, %c0_29] : memref<96x48xbf16, #tpu.memory_space<vmem>>, vector<96x48xbf16>
    %cst_30 = arith.constant dense<0.000000e+00> : vector<32x48xf32>
    %75 = tpu.matmul %73, %74, %cst_30 {dimension_numbers = #tpu.dot_dimension_numbers<[1], [0], [0], [1], [0, 0, 1, 1], [], []>} : vector<32x96xbf16>, vector<96x48xbf16>, vector<32x48xf32> -> vector<32x48xf32>
    %76 = vector.extract_strided_slice %0 {offsets = [5, 0], sizes = [1, 48], strides = [1, 1]} : vector<8x256xf32> to vector<1x48xf32>
    %77 = vector.broadcast %76 : vector<1x48xf32> to vector<32x48xf32>
    %78 = arith.addf %75, %77 : vector<32x48xf32>
    %cst_31 = arith.constant 0.000000e+00 : f32
    %79 = vector.broadcast %cst_31 : f32 to vector<32x48xf32>
    %80 = arith.maximumf %78, %79 : vector<32x48xf32>
    %81 = arith.truncf %80 : vector<32x48xf32> to vector<32x48xbf16>
    %c0_32 = arith.constant 0 : index
    %c0_33 = arith.constant 0 : index
    %82 = vector.load %arg11[%c0_32, %c0_33] : memref<48x3xbf16, #tpu.memory_space<vmem>>, vector<48x3xbf16>
    %cst_34 = arith.constant dense<0.000000e+00> : vector<32x3xf32>
    %83 = tpu.matmul %81, %82, %cst_34 {dimension_numbers = #tpu.dot_dimension_numbers<[1], [0], [0], [1], [0, 0, 1, 1], [], []>} : vector<32x48xbf16>, vector<48x3xbf16>, vector<32x3xf32> -> vector<32x3xf32>
    %84 = vector.extract_strided_slice %0 {offsets = [6, 0], sizes = [1, 3], strides = [1, 1]} : vector<8x256xf32> to vector<1x3xf32>
    %85 = vector.broadcast %84 : vector<1x3xf32> to vector<32x3xf32>
    %86 = arith.addf %83, %85 : vector<32x3xf32>
    %87 = arith.negf %86 : vector<32x3xf32>
    %88 = math.exp %87 : vector<32x3xf32>
    %cst_35 = arith.constant 1.000000e+00 : f32
    %89 = vector.broadcast %cst_35 : f32 to vector<32x3xf32>
    %90 = arith.addf %89, %88 : vector<32x3xf32>
    %91 = arith.divf %89, %90 : vector<32x3xf32>
    %c0_36 = arith.constant 0 : index
    %c0_37 = arith.constant 0 : index
    %92 = vector.load %arg12[%c0_36, %c0_37] : memref<32x3xf32, #tpu.memory_space<vmem>>, vector<32x3xf32>
    tpu.vector_store %arg12[%c0_36, %c0_37], %91 {strides = array<i32>} : memref<32x3xf32, #tpu.memory_space<vmem>>, vector<32x3xf32>,
    return
  }
  func.func @transform_0(%arg0: i32) -> (i32, i32) {
    %c0_i32 = arith.constant 0 : i32
    %c0_i32_0 = arith.constant 0 : i32
    return %arg0, %c0_i32 : i32, i32
  }
  func.func @transform_1(%arg0: i32) -> (i32, i32) {
    %c0_i32 = arith.constant 0 : i32
    %c0_i32_0 = arith.constant 0 : i32
    %c0_i32_1 = arith.constant 0 : i32
    return %c0_i32, %c0_i32_0 : i32, i32
  }
  func.func @transform_2(%arg0: i32) -> (i32, i32) {
    %c0_i32 = arith.constant 0 : i32
    %c0_i32_0 = arith.constant 0 : i32
    %c0_i32_1 = arith.constant 0 : i32
    return %c0_i32, %c0_i32_0 : i32, i32
  }
  func.func @transform_3(%arg0: i32) -> (i32, i32) {
    %c0_i32 = arith.constant 0 : i32
    %c0_i32_0 = arith.constant 0 : i32
    %c0_i32_1 = arith.constant 0 : i32
    return %c0_i32, %c0_i32_0 : i32, i32
  }
  func.func @transform_4(%arg0: i32) -> (i32, i32) {
    %c0_i32 = arith.constant 0 : i32
    %c0_i32_0 = arith.constant 0 : i32
    %c0_i32_1 = arith.constant 0 : i32
    return %c0_i32, %c0_i32_0 : i32, i32
  }
  func.func @transform_5(%arg0: i32) -> (i32, i32) {
    %c0_i32 = arith.constant 0 : i32
    %c0_i32_0 = arith.constant 0 : i32
    %c0_i32_1 = arith.constant 0 : i32
    return %c0_i32, %c0_i32_0 : i32, i32
  }
  func.func @transform_6(%arg0: i32) -> (i32, i32) {
    %c0_i32 = arith.constant 0 : i32
    %c0_i32_0 = arith.constant 0 : i32
    %c0_i32_1 = arith.constant 0 : i32
    return %c0_i32, %c0_i32_0 : i32, i32
  }
  func.func @transform_7(%arg0: i32) -> (i32, i32) {
    %c0_i32 = arith.constant 0 : i32
    %c0_i32_0 = arith.constant 0 : i32
    %c0_i32_1 = arith.constant 0 : i32
    return %c0_i32, %c0_i32_0 : i32, i32
  }
  func.func @transform_8(%arg0: i32) -> (i32, i32) {
    %c0_i32 = arith.constant 0 : i32
    %c0_i32_0 = arith.constant 0 : i32
    %c0_i32_1 = arith.constant 0 : i32
    return %c0_i32, %c0_i32_0 : i32, i32
  }
  func.func @transform_9(%arg0: i32) -> (i32, i32) {
    %c0_i32 = arith.constant 0 : i32
    %c0_i32_0 = arith.constant 0 : i32
    %c0_i32_1 = arith.constant 0 : i32
    return %c0_i32, %c0_i32_0 : i32, i32
  }
  func.func @transform_10(%arg0: i32) -> (i32, i32) {
    %c0_i32 = arith.constant 0 : i32
    %c0_i32_0 = arith.constant 0 : i32
    %c0_i32_1 = arith.constant 0 : i32
    return %c0_i32, %c0_i32_0 : i32, i32
  }
  func.func @transform_11(%arg0: i32) -> (i32, i32) {
    %c0_i32 = arith.constant 0 : i32
    %c0_i32_0 = arith.constant 0 : i32
    return %arg0, %c0_i32 : i32, i32
  }
}

</mosaic_0001>

<bundles_post_ra>
// kernel: tpu_custom_call.1
= control target key start
LH: loop header
LB: loop body
LE: loop exit
PB: predicated region body
PF: predicated region fallthrough
CT: control target
= control target key end

     0   :  { %s1979_s17 = smov 0   ;;  %s2251_s0 = inlined_call_operand.vmem [shape: s32[64,4], index: 0, kind: input, shape index: {}]   ;;  %s2252_s1 = inlined_call_operand.vmem [shape: bf16[100,32], index: 1, kind: input, shape index: {}]   ;;  %s2253_s2 = inlined_call_operand.vmem [shape: f32[8,256], index: 2, kind: input, shape index: {}]   ;;  %s2254_s3 = inlined_call_operand.vmem [shape: bf16[32,192], index: 3, kind: input, shape index: {}]   ;;  %s2255_s4 = inlined_call_operand.vmem [shape: bf16[192,96], index: 4, kind: input, shape index: {}]   ;;  %s2256_s5 = inlined_call_operand.vmem [shape: bf16[96,32], index: 5, kind: input, shape index: {}]   ;;  %s2257_s6 = inlined_call_operand.vmem [shape: bf16[32,96], index: 6, kind: input, shape index: {}]   ;;  %s2258_s7 = inlined_call_operand.vmem [shape: bf16[96,96], index: 7, kind: input, shape index: {}]   ;;  %s2259_s8 = inlined_call_operand.vmem [shape: bf16[96,96], index: 8, kind: input, shape index: {}]   ;;  %s2260_s9 = inlined_call_operand.vmem [shape: bf16[96,48], index: 9, kind: input, shape index: {}]   ;;  %s2261_s10 = inlined_call_operand.vmem [shape: bf16[48,3], index: 10, kind: input, shape index: {}]   ;;  %s2262_s11 = inlined_call_operand.vmem [shape: f32[64,3], index: 11, kind: output, shape index: {}]  }
   0x1 LB: > { %s1570_s18 = sadd.s32 4294967295, %s1912_s17   ;;  %p1574_p0 = scmp.ge.s32.totalorder %s1912_s17, 1  ;;  %s1912_s17 = sphi %s1979_s17, %s21_s17  }
   0x2   : > { %p338_p1 = scmp.lt.s32.totalorder %s1912_s17, 3 }
   0x4   : > { %p339_p2 = pnand %p1574_p0, %p338_p1 }
   0x5   : > { %s1575_s19 = sshll.u32 (!%p339_p2), %s1570_s18, 2  ;;  %v1914_v0 = vmov (!%p339_p2), 1   ;;  %v1915_v1 = vmov (!%p339_p2), 0   ;;  %v1836_v6 = vld [vmem:[%s2252_s1] sm:$0xff] (!%p339_p2)   ;;  %v1837_v7 = vld [vmem:[%s2252_s1 + $0x8] sm:$0xff] (!%p339_p2)   ;;  %v1916_v8 = vmov (!%p339_p2), 2   ;;  %v399_v26 = vlaneseq (!%p339_p2) }
   0x6   : > { %342 = sbr.rel (%p339_p2) target bundleno = 1988 (0x7c4), region = 64  ;;  %1828 = vset.pattern.permute.xlu1 (!%p339_p2), %v1914_v0  ;;  %1827 = vset.pattern.permute.xlu0 (!%p339_p2), %v1915_v1  ;;  %p379_p3 = scmp.lt.s32.totalorder (!%p339_p2), %s1575_s19, 7  ;;  %v1838_v9 = vld [vmem:[%s2252_s1 + $0x10] sm:$0xff] (!%p339_p2)   ;;  %v1917_v10 = vmov (!%p339_p2), 3   ;;  %v1839_v11 = vld [vmem:[%s2252_s1 + $0x18] sm:$0xff] (!%p339_p2)   ;;  %v1840_v12 = vld [vmem:[%s2252_s1 + $0x20] sm:$0xff] (!%p339_p2)  }
   0x7   : > { %672 = vmatprep.mubr.bf16.mxu1 (!%p339_p2), %v1915_v1  ;;  %1709 = vmatprep.subr.bf16.mxu0 (!%p339_p2), %v1836_v6  ;;  %v1841_v13 = vld [vmem:[%s2252_s1 + $0x28] sm:$0xff] (!%p339_p2)   ;;  %v1842_v14 = vld [vmem:[%s2252_s1 + $0x30] ss:$0 sps:$4 sm:$0x33] (!%p339_p2)   ;;  %vm546_vm0 = vcmask (!%p339_p2), 1041408   ;;  %v2026_v29 = vand.u32 (!%p339_p2), 127, %v399_v26 }
   0x8   : > { %1710 = vmatpush3.bf16.msra.mxu0 (!%p339_p2), %v1836_v6  ;;  %v548_v15 = vsel (!%p339_p2), %vm546_vm0, %v1842_v14, 0  ;;  %v1843_v16 = vld [vmem:[%s2254_s3 + $0x4] ss:$8 sps:$4 sm:$0xff] (!%p339_p2)   ;;  %v1845_v17 = vld [vmem:[%s2254_s3] ss:$8 sps:$4 sm:$0xff] (!%p339_p2)   ;;  %v1918_v35 = vmov (!%p339_p2), 0.0  }
   0x9   : > { %1711 = vmatprep.subr.bf16.mxu0 (!%p339_p2), %v1837_v7  ;;  %640 = vmatprep.subr.bf16.mxu1 (!%p339_p2), %v1843_v16  ;;  %v1846_v43 = vld [vmem:[%s2254_s3 + $0x14] ss:$8 sps:$4 sm:$0xff] (!%p339_p2)   ;;  %v1848_v44 = vld [vmem:[%s2254_s3 + $0x10] ss:$8 sps:$4 sm:$0xff] (!%p339_p2)   ;;  %v1849_v50 = vld [vmem:[%s2255_s4] sm:$0xff] (!%p339_p2)  }
   0xa   : > { %641 = vmatpush1.bf16.msra.mxu1 (!%p339_p2), %v1845_v17  ;;  %v1850_v52 = vld [vmem:[%s2255_s4 + $0x8] sm:$0xff] (!%p339_p2)   ;;  %v1851_v53 = vld [vmem:[%s2255_s4 + $0x10] sm:$0xff] (!%p339_p2)   ;;  %v1852_v54 = vld [vmem:[%s2255_s4 + $0x18] sm:$0xff] (!%p339_p2)  }
   0xb   : > { %642 = vmatprep.subr.bf16.mxu1 (!%p339_p2), %v1846_v43  ;;  %v1853_v55 = vld [vmem:[%s2255_s4 + $0x20] sm:$0xff] (!%p339_p2)   ;;  %v1854_v56 = vld [vmem:[%s2255_s4 + $0x28] sm:$0xff] (!%p339_p2)   ;;  %v1855_v57 = vld [vmem:[%s2255_s4 + $0x30] sm:$0xff] (!%p339_p2)  }
   0xc   : > { %1712 = vmatpush3.bf16.msra.mxu0 (!%p339_p2), %v1837_v7  ;;  %v1856_v58 = vld [vmem:[%s2255_s4 + $0x38] sm:$0xff] (!%p339_p2)   ;;  %v1857_v59 = vld [vmem:[%s2255_s4 + $0x40] sm:$0xff] (!%p339_p2)   ;;  %v1858_v60 = vld [vmem:[%s2255_s4 + $0x48] sm:$0xff] (!%p339_p2)  }
   0xd   : > { %s2264_s19 = smov (!%p379_p3, %s1575_s19), 7  ;;  %1713 = vmatprep.subr.bf16.mxu0 %v1838_v9  ;;  %v1859_v61 = vld [vmem:[%s2255_s4 + $0x50] sm:$0xff]   ;;  %v1860_v62 = vld [vmem:[%s2255_s4 + $0x58] sm:$0xff]   ;;  %v1861_v63 = vld [vmem:[%s2256_s5] sm:$0xff]  }
   0xe   : > { %s1576_s20 = sshll.u32 %s2264_s19, 3  ;;  %643 = vmatpush1.bf16.msra.mxu1 %v1848_v44 }
   0xf   : > { %s382_s23 = scalar_lea.vmem %s2251_s0, %s1576_s20  ;;  %812 = vmatprep.subr.bf16.mxu1 %v1915_v1  ;;  %s388_s22 = scalar_lea.vmem %s2262_s11, %s1576_s20 }
  0x10   : > { %v395_v2 = vld [vmem:[%s382_s23] sm:$0xff]  ;;  %v396_v3 = vld [vmem:[%s382_s23 + $0x8] sm:$0xff]  ;;  %v397_v4 = vld [vmem:[%s382_s23 + $0x10] sm:$0xff]  ;;  %1714 = vmatpush3.bf16.msra.mxu0 %v1838_v9 }
  0x11   : > { %418 = vperm.xlu1 %1828, %v395_v2   ;;  %402 = vperm.xlu0 %1827, %v395_v2   ;;  %v398_v5 = vld [vmem:[%s382_s23 + $0x18] sm:$0xff] }
  0x12   : > { %1715 = vmatprep.subr.bf16.mxu0 %v1839_v11 }
  0x14   : > { %1716 = vmatpush3.bf16.msra.mxu0 %v1839_v11 }
  0x15   : > { %421 = vperm.xlu1 %1828, %v396_v3   ;;  %405 = vperm.xlu0 %1827, %v396_v3  }
  0x16   : > { %1717 = vmatprep.subr.bf16.mxu0 %v1840_v12 }
  0x18   : > { %1718 = vmatpush3.bf16.msra.mxu0 %v1840_v12 }
  0x19   : > { %1829 = vset.pattern.permute.xlu1 %v1915_v1  ;;  %408 = vperm.xlu0 %1827, %v397_v4  }
  0x1a   : > { %411 = vperm.xlu1 %1829, %v398_v5   ;;  %1719 = vmatprep.subr.bf16.mxu0 %v1841_v13 }
  0x1c   : > { %1720 = vmatpush3.bf16.msra.mxu0 %v1841_v13 }
  0x1d   : > { %1830 = vset.pattern.permute.xlu0 %v1914_v0  ;;  %1813 = vmatprep.subr.msk.bf16.mxu0 %vm546_vm0, %v1842_v14 }
  0x1e   : > { %1831 = vset.pattern.permute.xlu1 %v1914_v0  ;;  %424 = vperm.xlu0 %1830, %v397_v4   ;;  %v1862_v0 = vld [vmem:[%s2256_s5 + $0x8] sm:$0xff]  }
  0x1f   : > { %427 = vperm.xlu1 %1831, %v398_v5  }
  0x20   : > { %1722 = vmatpush3.bf16.msra.mxu0 %v548_v15 }
  0x21   : > { %1727 = vmatprep.subr.bf16.mxu0 %v1861_v63 }
  0x22   : > { %1833 = vset.pattern.permute.xlu0 %v1916_v8 }
  0x23   : > { %1832 = vset.pattern.permute.xlu1 %v1916_v8  ;;  %441 = vperm.xlu0 %1833, %v396_v3  }
  0x24   : > { %438 = vperm.xlu1 %1832, %v395_v2  }
  0x27   : > { %1834 = vset.pattern.permute.xlu0 %v1917_v10 }
  0x28   : > { %444 = vperm.xlu1 %1832, %v397_v4   ;;  %458 = vperm.xlu0 %1834, %v395_v2   ;;  %v2108_v2 = vshrl.u32 %v399_v26, 7 }
  0x2c   : > { %447 = vperm.xlu1 %1832, %v398_v5   ;;  %467 = vperm.xlu0 %1834, %v398_v5   ;;  %v394_v5 = vld [vmem:[%s2253_s2 + $0x8] sm:$0xff] }
  0x30   : > { %1835 = vset.pattern.permute.xlu1 %v1917_v10 }
  0x31   : > { %461 = vperm.xlu1 %1835, %v396_v3   ;;  %v2111_v3 = vsub.s32 0, %v2108_v2 }
  0x33   : > { %v612_v7 = vrot.slane %v394_v5, %v2111_v3  ;;  %v1871_v5 = vld [vmem:[%s2258_s7 + $0x20] sm:$0xff]  }
  0x35   : > { %464 = vperm.xlu1 %1835, %v397_v4   ;;  %v2116_v4 = vld [vmem:[%s2253_s2] sm:$0xff] }
  0x36   : > { %v608_v6 = vrot.slane %v2116_v4, %v2111_v3 }
  0x90   : > { %v419_v18 = vpop.permute.xlu1 %418  ;;  %v403_v19 = vpop.permute.xlu0 %402 }
  0x91   : > { %vm429_vm1 = vcmp.eq.s32.totalorder %v2026_v29, %v419_v18  ;;  %vm413_vm2 = vcmp.eq.s32.totalorder %v2026_v29, %v403_v19 }
  0x92   : > { %vm433_vm6 = vmor %vm413_vm2, %vm429_vm1 }
  0x94   : > { %v422_v20 = vpop.permute.xlu1 %421  ;;  %v406_v21 = vpop.permute.xlu0 %405 }
  0x95   : > { %vm430_vm3 = vcmp.eq.s32.totalorder %v2026_v29, %v422_v20  ;;  %vm414_vm4 = vcmp.eq.s32.totalorder %v2026_v29, %v406_v21 }
  0x96   : > { %vm434_vm8 = vmor %vm414_vm4, %vm430_vm3 }
  0x98   : > { %v409_v22 = vpop.permute.xlu0 %408 }
  0x99   : > { %v412_v23 = vpop.permute.xlu1 %411 }
  0x9a   : > { %vm416_vm9 = vcmp.eq.s32.totalorder %v2026_v29, %v412_v23 }
  0x9d   : > { %v425_v24 = vpop.permute.xlu0 %424 }
  0x9e   : > { %v428_v25 = vpop.permute.xlu1 %427  ;;  %vm431_vm0 = vcmp.eq.s32.totalorder %v2026_v29, %v425_v24 }
  0x9f   : > { %vm432_vm5 = vcmp.eq.s32.totalorder %v2026_v29, %v428_v25 }
  0xa0   : > { %vm436_vm11 = vmor %vm416_vm9, %vm432_vm5  ;;  %vm415_vm5 = vcmp.eq.s32.totalorder %v2026_v29, %v409_v22 }
  0xa2   : > { %v442_v27 = vpop.permute.xlu0 %441 }
  0xa3   : > { %v439_v28 = vpop.permute.xlu1 %438  ;;  %vm450_vm7 = vcmp.eq.s32.totalorder %v2026_v29, %v442_v27 }
  0xa4   : > { %vm449_vm10 = vcmp.eq.s32.totalorder %v2026_v29, %v439_v28  ;;  %vm454_vm13 = vmor %vm434_vm8, %vm450_vm7 }
  0xa5   : > { %vm453_vm15 = vmor %vm433_vm6, %vm449_vm10  ;;  %vm539_vm6 = vcmask 818176  }
  0xa6   : > { %vm435_vm8 = vmor %vm415_vm5, %vm431_vm0  ;;  %vm919_vm0 = vcmask 785408  }
  0xa7   : > { %v445_v30 = vpop.permute.xlu1 %444  ;;  %v459_v31 = vpop.permute.xlu0 %458 }
  0xa8   : > { %vm469_vm12 = vcmp.eq.s32.totalorder %v2026_v29, %v459_v31  ;;  %vm451_vm9 = vcmp.eq.s32.totalorder %v2026_v29, %v445_v30 }
  0xa9   : > { %vm473_vm1 = vmor %vm453_vm15, %vm469_vm12  ;;  %vm805_vm15 = vcmask 523264  }
  0xaa   : > { %v1579_v36 = vsel %vm473_vm1, 1.0, %v1918_v35  ;;  %vm455_vm12 = vmor %vm435_vm8, %vm451_vm9  ;;  %vm1163_vm1 = vcmp.ge.s32.totalorder %v2026_v29, 32  ;;  %vm1429_vm9 = vcmask 392192  }
  0xab   : > { %v448_v32 = vpop.permute.xlu1 %447  ;;  %v468_v33 = vpop.permute.xlu0 %467 }
  0xac   : > { %vm452_vm14 = vcmp.eq.s32.totalorder %v2026_v29, %v448_v32  ;;  %vm472_vm3 = vcmp.eq.s32.totalorder %v2026_v29, %v468_v33 }
  0xad   : > { %vm456_vm2 = vmor %vm436_vm11, %vm452_vm14 }
  0xae   : > { %vm476_vm10 = vmor %vm456_vm2, %vm472_vm3  ;;  %vm1164_vm2 = vcmp.lt.s32.totalorder %v2026_v29, 64 }
  0xaf   : > { %v1582_v40 = vsel %vm476_vm10, 1.0, %v1918_v35  ;;  %vm1165_vm3 = vmand %vm1163_vm1, %vm1164_vm2 }
  0xb0   : > { %v462_v34 = vpop.permute.xlu1 %461 }
  0xb1   : > { %vm470_vm4 = vcmp.eq.s32.totalorder %v2026_v29, %v462_v34 }
  0xb2   : > { %vm474_vm7 = vmor %vm454_vm13, %vm470_vm4  ;;  %vm633_vm13 = vcmask 261120  }
  0xb3   : > { %v1580_v37 = vsel %vm474_vm7, 1.0, %v1918_v35  ;;  %vm1166_vm4 = vmpackc.low %vm1165_vm3, %vm1165_vm3  ;;  %vm1509_vm7 = vcmask 23552  }
  0xb4   : > { %v465_v38 = vpop.permute.xlu1 %464  ;;  %v485_v39 = vpack.c.bf16 %v1580_v37, %v1579_v36  ;;  %v1863_v37 = vld [vmem:[%s2256_s5 + $0x10] sm:$0xff]  }
  0xb5   : > { %vm471_vm11 = vcmp.eq.s32.totalorder %v2026_v29, %v465_v38  ;;  %v1864_v38 = vld [vmem:[%s2256_s5 + $0x18] sm:$0xff]  }
  0xb6   : > { %vm475_vm14 = vmor %vm455_vm12, %vm471_vm11  ;;  %1723 = vmatprep.mubr.msk.bf16.mxu0 %vm539_vm6, %v485_v39  ;;  %v1865_v39 = vld [vmem:[%s2256_s5 + $0x20] sm:$0xff]  }
  0xb7   : > { %v1581_v41 = vsel %vm475_vm14, 1.0, %v1918_v35 }
  0xb8   : > { %v486_v42 = vpack.c.bf16 %v1582_v40, %v1581_v41  ;;  %v1866_v40 = vld [vmem:[%s2256_s5 + $0x28] sm:$0xff]   ;;  %v1867_v41 = vld [vmem:[%s2258_s7] sm:$0xff]  }
  0xba   : > { %1724 = vmatmul.mubr.msk.bf16.vlgmr.msra.gmra.mrb[0].mxu0 %vm539_vm6, %v486_v42  ;;  %v731_v42 = vsub.s32 1, %v2108_v2 }
  0xbb   : > { %1728 = vmatpush3.bf16.msra.mxu0 %v1861_v63  ;;  %v1869_v63 = vld [vmem:[%s2258_s7 + $0x10] sm:$0xff]  }
  0xbc   : > { %1729 = vmatprep.subr.bf16.mxu0 %v1862_v0  ;;  %v732_v43 = vrot.slane %v2116_v4, %v731_v42 }
  0xbf   : > { %1730 = vmatpush3.bf16.msra.mxu0 %v1862_v0  ;;  %v1870_v0 = vld [vmem:[%s2258_s7 + $0x18] sm:$0xff]  }
  0xc0   : > { %1731 = vmatprep.subr.bf16.mxu0 %v1863_v37 }
  0xc3   : > { %1732 = vmatpush3.bf16.msra.mxu0 %v1863_v37 }
  0xc4   : > { %1733 = vmatprep.subr.bf16.mxu0 %v1864_v38 }
  0xc7   : > { %1734 = vmatpush3.bf16.msra.mxu0 %v1864_v38 }
  0xc8   : > { %1735 = vmatprep.subr.bf16.mxu0 %v1865_v39 }
  0xcb   : > { %1736 = vmatpush3.bf16.msra.mxu0 %v1865_v39 }
  0xcc   : > { %1737 = vmatprep.subr.bf16.mxu0 %v1866_v40 }
  0xcf   : > { %1738 = vmatpush3.bf16.msra.mxu0 %v1866_v40 }
  0xd0   : > { %1743 = vmatprep.subr.bf16.mxu0 %v1867_v41 }
 0x18d   : > { %v1725_v45 = vpop.f32.mrb[0].mxu0 }
 0x18e   : > { %v584_v46 = vpop.f32.mrb[1].mxu0 }
 0x18f   : > { %v1726_v47 = vpop.f32.mrb[2].mxu0 }
 0x190   : > { %v600_v48 = vpack.c.bf16 %v1726_v47, %v1725_v45  ;;  %v587_v49 = vpop.f32.mrb[3].mxu0 }
 0x191   : > { %v599_v51 = vpack.c.bf16 %v587_v49, %v584_v46 }
 0x193   : > { %1596 = vmatmul.mubr.msk.bf16.vlgmr.msra.gmra.mrb[0].mxu1 %vm633_vm13, %v599_v51 }
 0x194   : > { %682 = vmatprep.mubr.bf16.mxu1 %v1915_v1  ;;  %813 = vmatpush1.bf16.msra.mxu1 %v1849_v50 }
 0x195   : > { %814 = vmatprep.subr.bf16.mxu1 %v1915_v1 }
 0x198   : > { %815 = vmatpush1.bf16.msra.mxu1 %v1850_v52 }
 0x199   : > { %816 = vmatprep.subr.bf16.mxu1 %v1915_v1 }
 0x19b   : > { %1597 = vmatmul.mubr.msk.bf16.gmra.mrb[4].mxu1 %vm633_vm13, %v600_v48 }
 0x19c   : > { %817 = vmatpush1.bf16.msra.mxu1 %v1851_v53 }
 0x19d   : > { %818 = vmatprep.subr.bf16.mxu1 %v1915_v1 }
 0x1a0   : > { %819 = vmatpush1.bf16.msra.mxu1 %v1852_v54 }
 0x1a1   : > { %820 = vmatprep.subr.bf16.mxu1 %v1915_v1 }
 0x1a4   : > { %821 = vmatpush1.bf16.msra.mxu1 %v1853_v55 }
 0x1a5   : > { %822 = vmatprep.subr.bf16.mxu1 %v1915_v1 }
 0x1a8   : > { %823 = vmatpush1.bf16.msra.mxu1 %v1854_v56 }
 0x1a9   : > { %824 = vmatprep.subr.bf16.mxu1 %v1915_v1 }
 0x1ac   : > { %825 = vmatpush1.bf16.msra.mxu1 %v1855_v57 }
 0x1ad   : > { %826 = vmatprep.subr.bf16.mxu1 %v1915_v1 }
 0x1b0   : > { %827 = vmatpush1.bf16.msra.mxu1 %v1856_v58 }
 0x1b1   : > { %828 = vmatprep.subr.bf16.mxu1 %v1915_v1 }
 0x1b4   : > { %829 = vmatpush1.bf16.msra.mxu1 %v1857_v59 }
 0x1b5   : > { %830 = vmatprep.subr.bf16.mxu1 %v1915_v1 }
 0x1b8   : > { %831 = vmatpush1.bf16.msra.mxu1 %v1858_v60 }
 0x1b9   : > { %832 = vmatprep.subr.bf16.mxu1 %v1915_v1 }
 0x1bc   : > { %833 = vmatpush1.bf16.msra.mxu1 %v1859_v61 }
 0x1bd   : > { %834 = vmatprep.subr.bf16.mxu1 %v1915_v1 }
 0x1c0   : > { %835 = vmatpush1.bf16.msra.mxu1 %v1860_v62  ;;  %v1868_v62 = vld [vmem:[%s2258_s7 + $0x8] sm:$0xff]  }
 0x266   : > { %v674_v8 = vpop.f32.mrb[0].mxu1 }
 0x267   : > { %v675_v9 = vadd.f32 %v674_v8, %v608_v6  ;;  %v676_v10 = vpop.f32.mrb[1].mxu1  ;;  %v1874_v8 = vld [vmem:[%s2257_s6 + $0x8] sm:$0xff]  }
 0x268   : > { %v677_v11 = vadd.f32 %v676_v10, %v612_v7  ;;  %v678_v12 = vpop.f32.mrb[2].mxu1  ;;  %v1876_v10 = vld [vmem:[%s2259_s8 + $0x8] sm:$0xff]  }
 0x269   : > { %v679_v13 = vadd.f32 %v678_v12, %v608_v6  ;;  %v680_v14 = vpop.f32.mrb[3].mxu1  ;;  %v693_v16 = vmax.f32 %v675_v9, 0.0  ;;  %v1875_v9 = vld [vmem:[%s2259_s8] sm:$0xff]   ;;  %v881_v12 = vsub.s32 2, %v2108_v2 }
 0x26a   : > { %v681_v15 = vadd.f32 %v680_v14, %v612_v7  ;;  %v694_v18 = vmax.f32 %v677_v11, 0.0  ;;  %1767 = vmatprep.subr.bf16.mxu1 %v1875_v9  ;;  %v1877_v11 = vld [vmem:[%s2259_s8 + $0x10] sm:$0xff]  }
 0x26b   : > { %v695_v17 = vmax.f32 %v679_v13, 0.0  ;;  %v882_v13 = vrot.slane %v2116_v4, %v881_v12  ;;  %v1888_v12 = vld [vmem:[%s2261_s10 + $0x8] sm:$0xff]  }
 0x26c   : > { %v696_v19 = vmax.f32 %v681_v15, 0.0 }
 0x26d   : > { %v701_v20 = vpack.c.bf16 %v695_v17, %v693_v16 }
 0x26e   : > { %v702_v21 = vpack.c.bf16 %v696_v19, %v694_v18  ;;  %v684_v22 = vpop.f32.mrb[4].mxu1 }
 0x26f   : > { %v685_v23 = vadd.f32 %v684_v22, %v608_v6  ;;  %v686_v24 = vpop.f32.mrb[5].mxu1 }
 0x270   : > { %v687_v25 = vadd.f32 %v686_v24, %v612_v7  ;;  %v688_v26 = vpop.f32.mrb[6].mxu1  ;;  %1610 = vmatprep.mubr.msk.bf16.mxu1 %vm805_vm15, %v702_v21 }
 0x271   : > { %v689_v27 = vadd.f32 %v688_v26, %v608_v6  ;;  %v690_v28 = vpop.f32.mrb[7].mxu1  ;;  %845 = vmatmul.mubr.bf16.vlgmr.msra.gmra.mrb[8].mxu1 %v701_v20  ;;  %v697_v31 = vmax.f32 %v685_v23, 0.0  ;;  %v1872_v6 = vld [vmem:[%s2258_s7 + $0x28] sm:$0xff]  }
 0x272   : > { %v691_v30 = vadd.f32 %v690_v28, %v612_v7  ;;  %v698_v33 = vmax.f32 %v687_v25, 0.0  ;;  %v1873_v7 = vld [vmem:[%s2257_s6] sm:$0xff]   ;;  %1768 = vmatpush3.bf16.msra.mxu1 %v1875_v9  ;;  %v1878_v28 = vld [vmem:[%s2259_s8 + $0x18] sm:$0xff]  }
 0x273   : > { %v699_v32 = vmax.f32 %v689_v27, 0.0  ;;  %1769 = vmatprep.subr.bf16.mxu1 %v1876_v10 }
 0x274   : > { %v700_v34 = vmax.f32 %v691_v30, 0.0  ;;  %v1879_v30 = vld [vmem:[%s2259_s8 + $0x20] sm:$0xff]  }
 0x275   : > { %v703_v35 = vpack.c.bf16 %v699_v32, %v697_v31  ;;  %v1880_v31 = vld [vmem:[%s2259_s8 + $0x28] sm:$0xff]   ;;  %v1881_v32 = vld [vmem:[%s2260_s9] sm:$0xff]  }
 0x276   : > { %v704_v36 = vpack.c.bf16 %v700_v34, %v698_v33  ;;  %1770 = vmatpush3.bf16.msra.mxu1 %v1876_v10  ;;  %v1151_v33 = vsub.s32 3, %v2108_v2 }
 0x277   : > { %1771 = vmatprep.subr.bf16.mxu1 %v1877_v11 }
 0x278   : > { %1611 = vmatprep.mubr.msk.bf16.mxu1 %vm805_vm15, %v704_v36  ;;  %v1152_v34 = vrot.slane %v2116_v4, %v1151_v33  ;;  %v1167_v36 = vsel %vm1166_vm4, 65537, %v1915_v1  ;;  %v1882_v1 = vld [vmem:[%s2260_s9 + $0x8] sm:$0xff]  }
 0x279   : > { %853 = vmatmul.mubr.bf16.gmra.mrb[12].mxu1 %v703_v35 }
 0x27a   : > { %1772 = vmatpush3.bf16.msra.mxu1 %v1877_v11 }
 0x27b   : > { %1773 = vmatprep.subr.bf16.mxu1 %v1878_v28 }
 0x27e   : > { %1774 = vmatpush3.bf16.msra.mxu1 %v1878_v28 }
 0x27f   : > { %1775 = vmatprep.subr.bf16.mxu1 %v1879_v30 }
 0x282   : > { %1776 = vmatpush3.bf16.msra.mxu1 %v1879_v30 }
 0x283   : > { %1777 = vmatprep.subr.bf16.mxu1 %v1880_v31 }
 0x286   : > { %1778 = vmatpush3.bf16.msra.mxu1 %v1880_v31  ;;  %v1409_v31 = vsub.s32 6, %v2108_v2 }
 0x287   : > { %1783 = vmatprep.subr.bf16.mxu1 %v1881_v32 }
 0x344   : > { %v846_v44 = vpop.f32.mrb[8].mxu1 }
 0x345   : > { %v847_v45 = vadd.f32 %v846_v44, %v732_v43  ;;  %v848_v46 = vpop.f32.mrb[9].mxu1 }
 0x346   : > { %v849_v47 = vpop.f32.mrb[10].mxu1 }
 0x347   : > { %v850_v48 = vadd.f32 %v849_v47, %v732_v43  ;;  %v851_v49 = vpop.f32.mrb[11].mxu1  ;;  %v861_v50 = vmax.f32 %v847_v45, 0.0 }
 0x349   : > { %v862_v51 = vmax.f32 %v850_v48, 0.0 }
 0x34b   : > { %v2143_v52 = vpack.c.bf16 %v862_v51, %v861_v50 }
 0x34c   : > { %v854_v53 = vpop.f32.mrb[12].mxu1 }
 0x34d   : > { %v855_v54 = vadd.f32 %v854_v53, %v732_v43  ;;  %v856_v55 = vpop.f32.mrb[13].mxu1  ;;  %1739 = vmatprep.mubr.msk.bf16.mxu0 %vm919_vm0, %v2143_v52  ;;  %v1885_v53 = vld [vmem:[%s2260_s9 + $0x20] sm:$0xff]  }
 0x34e   : > { %v857_v56 = vpop.f32.mrb[14].mxu1  ;;  %v1887_v55 = vld [vmem:[%s2261_s10] sm:$0xff]  }
 0x34f   : > { %v858_v57 = vadd.f32 %v857_v56, %v732_v43  ;;  %v859_v58 = vpop.f32.mrb[15].mxu1  ;;  %v863_v59 = vmax.f32 %v855_v54, 0.0  ;;  %v1171_v43 = vrot.slane %v1167_v36, %v2111_v3  ;;  %v1883_v3 = vld [vmem:[%s2260_s9 + $0x10] sm:$0xff]   ;;  %v1886_v54 = vld [vmem:[%s2260_s9 + $0x28] sm:$0xff]   ;;  %v1189_v56 = vsub.s32 4, %v2108_v2 }
 0x351   : > { %v864_v60 = vmax.f32 %v858_v57, 0.0  ;;  %vm1172_vm5 = vcmp.ne.s16.totalorder %v1171_v43, 0  ;;  %v1190_v57 = vrot.slane %v2116_v4, %v1189_v56 }
 0x353   : > { %v2147_v61 = vpack.c.bf16 %v864_v60, %v863_v59 }
 0x355   : > { %1740 = vmatmul.mubr.msk.bf16.vlgmr.msra.gmra.mrb[4].mxu0 %vm919_vm0, %v2147_v61 }
 0x356   : > { %1744 = vmatpush3.bf16.msra.mxu0 %v1867_v41  ;;  %1755 = vmatprep.mubr.msk.bf16.mxu0 %vm919_vm0, %v2143_v52 }
 0x357   : > { %1745 = vmatprep.subr.bf16.mxu0 %v1868_v62 }
 0x35a   : > { %1746 = vmatpush3.bf16.msra.mxu0 %v1868_v62 }
 0x35b   : > { %1747 = vmatprep.subr.bf16.mxu0 %v1869_v63 }
 0x35e   : > { %1748 = vmatpush3.bf16.msra.mxu0 %v1869_v63 }
 0x35f   : > { %1749 = vmatprep.subr.bf16.mxu0 %v1870_v0 }
 0x362   : > { %1750 = vmatpush3.bf16.msra.mxu0 %v1870_v0 }
 0x363   : > { %1751 = vmatprep.subr.bf16.mxu0 %v1871_v5 }
 0x366   : > { %1752 = vmatpush3.bf16.msra.mxu0 %v1871_v5 }
 0x367   : > { %1753 = vmatprep.subr.bf16.mxu0 %v1872_v6 }
 0x36a   : > { %1754 = vmatpush3.bf16.msra.mxu0 %v1872_v6 }
 0x36b   : > { %1759 = vmatprep.subr.bf16.mxu0 %v1873_v7 }
 0x36d   : > { %1756 = vmatmul.mubr.msk.bf16.vlgmr.msra.gmra.mrb[8].mxu0 %vm919_vm0, %v2147_v61 }
 0x36e   : > { %1760 = vmatpush3.bf16.msra.mxu0 %v1873_v7 }
 0x36f   : > { %1761 = vmatprep.subr.bf16.mxu0 %v1874_v8 }
 0x372   : > { %1762 = vmatpush3.bf16.msra.mxu0 %v1874_v8 }
 0x373   : > { %1799 = vmatprep.subr.bf16.mxu0 %v1887_v55 }
 0x428   : > { %v1741_v14 = vpop.f32.mrb[4].mxu0 }
 0x429   : > { %v969_v15 = vadd.f32 %v1741_v14, %v882_v13  ;;  %v960_v16 = vpop.f32.mrb[5].mxu0  ;;  %v1302_v14 = vsub.s32 5, %v2108_v2 }
 0x42a   : > { %v961_v17 = vadd.f32 %v960_v16, %v882_v13  ;;  %v1742_v18 = vpop.f32.mrb[6].mxu0 }
 0x42b   : > { %v972_v19 = vadd.f32 %v1742_v18, %v882_v13  ;;  %v963_v20 = vpop.f32.mrb[7].mxu0  ;;  %v977_v22 = vmax.f32 %v969_v15, 0.0  ;;  %v1303_v15 = vrot.slane %v2116_v4, %v1302_v14 }
 0x42c   : > { %v964_v21 = vadd.f32 %v963_v20, %v882_v13  ;;  %v975_v24 = vmax.f32 %v961_v17, 0.0  ;;  %v1889_v13 = vld [vmem:[%s2261_s10 + $0x10] sm:$0xff]  }
 0x42d   : > { %v978_v23 = vmax.f32 %v972_v19, 0.0 }
 0x42e   : > { %v976_v25 = vmax.f32 %v964_v21, 0.0 }
 0x42f   : > { %v980_v26 = vpack.c.bf16 %v978_v23, %v977_v22 }
 0x430   : > { %v979_v27 = vpack.c.bf16 %v976_v25, %v975_v24 }
 0x432   : > { %1763 = vmatprep.mubr.msk.bf16.mxu0 %vm633_vm13, %v979_v27 }
 0x433   : > { %1764 = vmatmul.mubr.msk.bf16.vlgmr.msra.gmra.mrb[8].mxu0 %vm633_vm13, %v980_v26 }
 0x434   : > { %1800 = vmatpush3.bf16.msra.mxu0 %v1887_v55 }
 0x435   : > { %1801 = vmatprep.subr.bf16.mxu0 %v1888_v12 }
 0x438   : > { %1802 = vmatpush3.bf16.msra.mxu0 %v1888_v12 }
 0x439   : > { %1803 = vmatprep.subr.bf16.mxu0 %v1889_v13 }
 0x43c   : > { %1804 = vmatpush3.bf16.msra.mxu0 %v1889_v13 }
 0x506   : > { %v1765_v35 = vpop.f32.mrb[8].mxu0 }
 0x507   : > { %v1155_v37 = vadd.f32 %v1765_v35, %v1152_v34  ;;  %v1134_v38 = vpop.f32.mrb[9].mxu0 }
 0x508   : > { %v1153_v39 = vadd.f32 %v1152_v34, %v1134_v38  ;;  %v1766_v40 = vpop.f32.mrb[10].mxu0 }
 0x509   : > { %v1156_v41 = vadd.f32 %v1766_v40, %v1152_v34  ;;  %v1137_v42 = vpop.f32.mrb[11].mxu0  ;;  %v1159_v45 = vmax.f32 %v1155_v37, 0.0 }
 0x50a   : > { %v1154_v44 = vadd.f32 %v1152_v34, %v1137_v42  ;;  %v1157_v46 = vmax.f32 %v1153_v39, 0.0 }
 0x50b   : > { %v1160_v29 = vmax.f32 %v1156_v41, 0.0 }
 0x50c   : > { %v1158_v47 = vmax.f32 %v1154_v44, 0.0 }
 0x50d   : > { %v1162_v48 = vpack.c.bf16 %v1160_v29, %v1159_v45 }
 0x50e   : > { %v1161_v49 = vpack.c.bf16 %v1158_v47, %v1157_v46 }
 0x50f   : > { %v1174_v51 = vsel %vm1172_vm5, %v1162_v48, %v2147_v61 }
 0x510   : > { %v1173_v50 = vsel %vm1172_vm5, %v1161_v49, %v2143_v52  ;;  %v1884_v52 = vld [vmem:[%s2260_s9 + $0x18] sm:$0xff]  }
 0x511   : > { %1779 = vmatprep.mubr.msk.bf16.mxu1 %vm919_vm0, %v1173_v50 }
 0x512   : > { %1780 = vmatmul.mubr.msk.bf16.vlgmr.msra.gmra.mrb[16].mxu1 %vm919_vm0, %v1174_v51 }
 0x513   : > { %1784 = vmatpush3.bf16.msra.mxu1 %v1881_v32  ;;  %v1410_v32 = vrot.slane %v2116_v4, %v1409_v31 }
 0x514   : > { %1785 = vmatprep.subr.bf16.mxu1 %v1882_v1 }
 0x517   : > { %1786 = vmatpush3.bf16.msra.mxu1 %v1882_v1 }
 0x518   : > { %1787 = vmatprep.subr.bf16.mxu1 %v1883_v3 }
 0x51b   : > { %1788 = vmatpush3.bf16.msra.mxu1 %v1883_v3 }
 0x51c   : > { %1789 = vmatprep.subr.bf16.mxu1 %v1884_v52 }
 0x51f   : > { %1790 = vmatpush3.bf16.msra.mxu1 %v1884_v52 }
 0x520   : > { %1791 = vmatprep.subr.bf16.mxu1 %v1885_v53 }
 0x523   : > { %1792 = vmatpush3.bf16.msra.mxu1 %v1885_v53 }
 0x524   : > { %1793 = vmatprep.subr.bf16.mxu1 %v1886_v54 }
 0x527   : > { %1794 = vmatpush3.bf16.msra.mxu1 %v1886_v54 }
 0x5e5   : > { %v1781_v58 = vpop.f32.mrb[16].mxu1 }
 0x5e6   : > { %v1276_v59 = vadd.f32 %v1781_v58, %v1190_v57  ;;  %v1267_v60 = vpop.f32.mrb[17].mxu1 }
 0x5e7   : > { %v1268_v61 = vadd.f32 %v1267_v60, %v1190_v57  ;;  %v1782_v62 = vpop.f32.mrb[18].mxu1 }
 0x5e8   : > { %v1279_v63 = vadd.f32 %v1782_v62, %v1190_v57  ;;  %v1270_v0 = vpop.f32.mrb[19].mxu1  ;;  %v1284_v6 = vmax.f32 %v1276_v59, 0.0 }
 0x5e9   : > { %v1271_v5 = vadd.f32 %v1270_v0, %v1190_v57  ;;  %v1282_v8 = vmax.f32 %v1268_v61, 0.0 }
 0x5ea   : > { %v1285_v7 = vmax.f32 %v1279_v63, 0.0 }
 0x5eb   : > { %v1283_v9 = vmax.f32 %v1271_v5, 0.0 }
 0x5ec   : > { %v1287_v10 = vpack.c.bf16 %v1285_v7, %v1284_v6 }
 0x5ed   : > { %v1286_v11 = vpack.c.bf16 %v1283_v9, %v1282_v8 }
 0x5ef   : > { %1795 = vmatprep.mubr.msk.bf16.mxu1 %vm919_vm0, %v1286_v11 }
 0x5f0   : > { %1796 = vmatmul.mubr.msk.bf16.vlgmr.msra.gmra.mrb[20].mxu1 %vm919_vm0, %v1287_v10 }
 0x6c3   : > { %v1797_v16 = vpop.f32.mrb[20].mxu1 }
 0x6c4   : > { %v1389_v17 = vadd.f32 %v1797_v16, %v1303_v15  ;;  %v1380_v18 = vpop.f32.mrb[21].mxu1 }
 0x6c5   : > { %v1381_v19 = vadd.f32 %v1380_v18, %v1303_v15  ;;  %v1798_v20 = vpop.f32.mrb[22].mxu1 }
 0x6c6   : > { %v1392_v21 = vadd.f32 %v1798_v20, %v1303_v15  ;;  %v1383_v22 = vpop.f32.mrb[23].mxu1  ;;  %v1397_v24 = vmax.f32 %v1389_v17, 0.0 }
 0x6c7   : > { %v1384_v23 = vadd.f32 %v1383_v22, %v1303_v15  ;;  %v1395_v26 = vmax.f32 %v1381_v19, 0.0 }
 0x6c8   : > { %v1398_v25 = vmax.f32 %v1392_v21, 0.0 }
 0x6c9   : > { %v1396_v27 = vmax.f32 %v1384_v23, 0.0 }
 0x6ca   : > { %v1400_v28 = vpack.c.bf16 %v1398_v25, %v1397_v24 }
 0x6cb   : > { %v1399_v30 = vpack.c.bf16 %v1396_v27, %v1395_v26 }
 0x6cd   : > { %1805 = vmatprep.mubr.msk.bf16.mxu0 %vm1429_vm9, %v1399_v30 }
 0x6ce   : > { %1806 = vmatmul.mubr.msk.bf16.vlgmr.msra.gmra.mrb[12].mxu0 %vm1429_vm9, %v1400_v28 }
 0x7a1   : > { %v1807_v33 = vpop.f32.mrb[12].mxu0 }
 0x7a2   : > { %v1479_v34 = vadd.f32 %v1807_v33, %v1410_v32  ;;  %v1470_v35 = vpop.f32.mrb[13].mxu0 }
 0x7a3   : > { %v1471_v36 = vadd.f32 %v1470_v35, %v1410_v32  ;;  %v1808_v37 = vpop.f32.mrb[14].mxu0 }
 0x7a4   : > { %v1655_v38 = vmul.f32 -1.442695, %v1479_v34  ;;  %v1482_v39 = vadd.f32 %v1808_v37, %v1410_v32  ;;  %v1473_v40 = vpop.f32.mrb[15].mxu0 }
 0x7a5   : > { %v1653_v41 = vmul.f32 -1.442695, %v1471_v36  ;;  %v1474_v42 = vadd.f32 %v1473_v40, %v1410_v32 }
 0x7a6   : > { %1890 = vpow2.f32 %v1655_v38  ;;  %v1656_v43 = vmul.f32 -1.442695, %v1482_v39 }
 0x7a7   : > { %1892 = vpow2.f32 %v1653_v41  ;;  %v1654_v44 = vmul.f32 -1.442695, %v1474_v42 }
 0x7a8   : > { %1894 = vpow2.f32 %v1656_v43 }
 0x7a9   : > { %1896 = vpow2.f32 %v1654_v44 }
 0x7b0   : > { %v1891_v2 = vpop.eup %1890 }
 0x7b1   : > { %v1893_v45 = vpop.eup %1892  ;;  %v1499_v47 = vadd.f32 1.0, %v1891_v2 }
 0x7b2   : > { %v1895_v4 = vpop.eup %1894  ;;  %v1497_v29 = vadd.f32 1.0, %v1893_v45 }
 0x7b3   : > { %v1897_v46 = vpop.eup %1896  ;;  %v1500_v48 = vadd.f32 1.0, %v1895_v4 }
 0x7b4   : > { %1898 = vrcp.f32 %v1497_v29  ;;  %v1498_v49 = vadd.f32 1.0, %v1897_v46 }
 0x7b6   : > { %1900 = vrcp.f32 %v1498_v49 }
 0x7b7   : > { %1902 = vrcp.f32 %v1499_v47 }
 0x7b8   : > { %1904 = vrcp.f32 %v1500_v48 }
 0x7be   : > { %v1899_v50 = vpop.eup %1898 }
 0x7bf   : > { %1510 = vst.msk [vmem:[%s388_s22] sm:$0xff] %vm1509_vm7, %v1899_v50 }
 0x7c0   : > { %v1901_v1 = vpop.eup %1900 }
 0x7c1   : > { %v1903_v51 = vpop.eup %1902  ;;  %1511 = vst.msk [vmem:[%s388_s22 + $0x8] sm:$0xff] %vm1509_vm7, %v1901_v1 }
 0x7c2   : > { %v1905_v3 = vpop.eup %1904  ;;  %1512 = vst.msk [vmem:[%s388_s22 + $0x10] sm:$0xff] %vm1509_vm7, %v1903_v51 }
 0x7c3   : > { %1513 = vst.msk [vmem:[%s388_s22 + $0x18] sm:$0xff] %vm1509_vm7, %v1905_v3 }
 0x7c4 PF: > { %s21_s17 = sadd.s32 1, %s1912_s17  }
 0x7c5   : > { %p18_p4 = scmp.ge.s32.totalorder %s21_s17, 4  }
 0x7c7   :  { %20 = sbr.rel (!%p18_p4) target bundleno = 1 (0x1), region = 94 }

</bundles_post_ra>
